<compile_context>
chip_gen: v6e
topology: v6e:2x2x1
jax: 0.10.0
libtpu: 0.0.40
codegen_flags: <defaults>
</compile_context>

<pallas_src>
import functools

import jax
import jax.numpy as jnp
import numpy as np
from jax.experimental import pallas as pl
from jax.experimental.pallas import tpu as pltpu

LANE = 128
SUBLANE = 8


def _round_up(x, m):
    return ((x + m - 1) // m) * m


# ----------------------------------------------------------------------------
# Pallas kernel: one LSTM cell step, single fused matmul, dense gate columns.
#   z_ref : (TB, Kp)  bf16  -- [x | h] concatenated + zero-padded in wrapper
#   c_ref : (TB, H)   f32
#   w_ref : (Kp, G)   bf16  -- row-stacked [W_ih^T ; W_hh^T], G = round_up(4H, 128)
#   b_ref : (1, G)    f32   -- b_ih + b_hh (dense gate layout)
# Gate ordering follows PyTorch LSTM: i, f, g, o.
# ----------------------------------------------------------------------------
def lstm_step_kernel(z_ref, c_ref, w_ref, b_ref, h_out_ref, c_out_ref):
    H = c_ref.shape[-1]

    # Single fused MXU matmul, f32 accumulation.
    gates = jnp.dot(z_ref[...], w_ref[...],
                    preferred_element_type=jnp.float32) + b_ref[...]

    if H % 128 == 0:
        # Lane-aligned per-gate slices: minimal EUP work (4H transcendental lanes).
        i_g = jax.nn.sigmoid(gates[:, 0 * H:1 * H])
        f_g = jax.nn.sigmoid(gates[:, 1 * H:2 * H])
        g_g = jnp.tanh(gates[:, 2 * H:3 * H])
        o_g = jax.nn.sigmoid(gates[:, 3 * H:4 * H])
    else:
        # H < 128: dense gate packing (no per-gate 128-lane padding).  One
        # sigmoid + one tanh pass over the (few-vreg) gate width with a
        # lane-mask select for the 'g' segment, then narrow static slices.
        lane = jax.lax.broadcasted_iota(jnp.int32, gates.shape, dimension=1)
        is_g = (lane >= 2 * H) & (lane < 3 * H)
        act = jnp.where(is_g, jnp.tanh(gates), jax.nn.sigmoid(gates))
        i_g = act[:, 0 * H:1 * H]
        f_g = act[:, 1 * H:2 * H]
        g_g = act[:, 2 * H:3 * H]
        o_g = act[:, 3 * H:4 * H]

    # f32 element-wise gate math and cell state (v5e VPU/EUP have no bf16 path).
    c_new = f_g * c_ref[...] + i_g * g_g
    h_new = o_g * jnp.tanh(c_new)

    c_out_ref[...] = c_new.astype(c_out_ref.dtype)
    h_out_ref[...] = h_new.astype(h_out_ref.dtype)


# ----------------------------------------------------------------------------
# Parameter packing: one lane-dense, row-stacked bf16 weight with dense gates.
# ----------------------------------------------------------------------------
def pack_lstm_params(w_ih, w_hh, b_ih, b_hh):
    """w_ih: (4H, X), w_hh: (4H, H), biases: (4H,).
    Returns W: (Kp, G) bf16 with Kp = round_up(X+H, 128), G = round_up(4H, 128),
    and b: (1, G) f32.  Gate columns packed densely in PyTorch order i|f|g|o."""
    four_h, X = w_ih.shape
    H = w_hh.shape[1]
    K = X + H
    Kp = _round_up(K, LANE)
    G = _round_up(four_h, LANE)

    W = jnp.zeros((Kp, G), jnp.float32)
    W = W.at[:X, :four_h].set(w_ih.T.astype(jnp.float32))
    W = W.at[X:K, :four_h].set(w_hh.T.astype(jnp.float32))
    b = jnp.zeros((1, G), jnp.float32)
    b = b.at[0, :four_h].set((b_ih + b_hh).astype(jnp.float32))
    return W.astype(jnp.bfloat16), b


def _batch_tiling(B):
    """Choose (batch_tile, padded_batch).  padded_batch is ALWAYS a multiple of
    the tile, so no remainder rows are ever dropped."""
    B8 = _round_up(max(int(B), 1), SUBLANE)
    if B8 <= 128:
        tb = B8            # one tile; splitting tiny batches only adds step overhead
    else:
        # >=2 tiles so the 'parallel' batch axis can shard across both v7x
        # TensorCores; tile capped at 256 rows (amortizes per-step overhead and
        # the 256-wide MXU on v6e/v7x) while keeping per-tile VMEM small.
        tb = min(_round_up((B8 + 1) // 2, SUBLANE), 256)
    Bp = _round_up(B8, tb)
    return tb, Bp


def _vmem_capacity_bytes():
    """Generation-aware VMEM capacity (v5e/v6e: 128 MiB, v7x: 64 MiB per TC)."""
    try:
        cap = getattr(pltpu.get_tpu_info(), "vmem_capacity_bytes", None)
        if cap:
            return int(cap)
    except Exception:
        pass
    return 64 << 20   # conservative default (v7x per-core VMEM)


# ----------------------------------------------------------------------------
# Wrapper reproducing GlobalReconstructor.forward
# ----------------------------------------------------------------------------
@functools.partial(jax.jit, static_argnames=("hidden_size", "h_dtype"))
def global_reconstructor_forward(decoder_hidden, decoder_hiddens_mean_pooled,
                                 hidden, params, *, hidden_size,
                                 h_dtype=jnp.float32):
    """decoder_hidden, decoder_hiddens_mean_pooled: (B, decoder_size)
       hidden: (h0, c0), each (num_layers*num_directions=1, B, hidden_size)
       params: {'W': (Kp, G) bf16, 'b': (1, G) f32}  (see pack_lstm_params)
       returns (output (1,B,H), (h (1,B,H), c (1,B,H)))"""
    h0, c0 = hidden
    B = decoder_hidden.shape[0]
    H = hidden_size

    W = params["W"]
    b = params["b"]
    Kp, G = W.shape
    X = decoder_hidden.shape[1] + decoder_hiddens_mean_pooled.shape[1]
    K = X + H
    assert Kp == _round_up(K, LANE) and G == _round_up(4 * H, LANE), \
        "packed params do not match input/hidden sizes"

    TB, Bp = _batch_tiling(B)
    n_tiles = Bp // TB

    # torch.cat([...], dim=1) fused with h0 in the wrapper -> a single padded
    # bf16 matmul operand; the cell state c stays a separate f32 input.
    z = jnp.concatenate(
        [decoder_hidden, decoder_hiddens_mean_pooled, h0[0]], axis=1
    ).astype(jnp.bfloat16)
    z_p = jnp.zeros((Bp, Kp), jnp.bfloat16).at[:B, :K].set(z)
    c_p = jnp.zeros((Bp, H), jnp.float32).at[:B, :].set(c0[0].astype(jnp.float32))

    h_bytes = jnp.dtype(h_dtype).itemsize

    flops = 2 * Bp * Kp * G
    transcendentals = (5 * Bp * H) if H % 128 == 0 else (2 * Bp * G + Bp * H)
    bytes_accessed = (W.size * 2 + b.size * 4
                      + Bp * Kp * 2 + Bp * H * 4
                      + Bp * H * h_bytes + Bp * H * 4)

    # Weights/bias single-buffered (Buffered(1)), tiles double-buffered, + slack.
    vmem_cap = _vmem_capacity_bytes()
    vmem_headroom = max(12 << 20, vmem_cap // 8)   # room for Mosaic internal scratch
    vmem_need = (W.size * 2 + b.size * 4
                 + 2 * TB * Kp * 2
                 + 2 * TB * H * 4
                 + 2 * TB * H * h_bytes + 2 * TB * H * 4
                 + (2 << 20))
    vmem_limit = int(min(max(vmem_need, 16 << 20), vmem_cap - vmem_headroom))

    h_new, c_new = pl.pallas_call(
        lstm_step_kernel,
        out_shape=(
            jax.ShapeDtypeStruct((Bp, H), h_dtype),
            jax.ShapeDtypeStruct((Bp, H), jnp.float32),
        ),
        grid=(n_tiles,),
        in_specs=[
            pl.BlockSpec((TB, Kp), lambda i: (i, 0)),
            pl.BlockSpec((TB, H), lambda i: (i, 0)),
            # Resident weights / bias: constant index_map + single buffering.
            pl.BlockSpec((Kp, G), lambda i: (0, 0), pipeline_mode=pl.Buffered(1)),
            pl.BlockSpec((1, G), lambda i: (0, 0), pipeline_mode=pl.Buffered(1)),
        ],
        out_specs=(
            pl.BlockSpec((TB, H), lambda i: (i, 0)),
            pl.BlockSpec((TB, H), lambda i: (i, 0)),
        ),
        compiler_params=pltpu.CompilerParams(
            dimension_semantics=("parallel",),
            vmem_limit_bytes=vmem_limit,
        ),
        cost_estimate=pl.CostEstimate(
            flops=flops,
            transcendentals=transcendentals,
            bytes_accessed=bytes_accessed,
        ),
    )(z_p, c_p, W, b)

    h_out = h_new[:B]
    c_out = c_new[:B]
    output = h_out[None]                       # (1, B, H) — seq_len == 1 LSTM output
    return output, (h_out[None], c_out[None])


# ----------------------------------------------------------------------------
# Pure-JAX reference (PyTorch LSTM cell semantics).
# matmul_dtype=bf16 mirrors the kernel's bf16-operand / f32-accumulate path.
# ----------------------------------------------------------------------------
def ref_forward(decoder_hidden, decoder_hiddens_mean_pooled, hidden,
                w_ih, w_hh, b_ih, b_hh, matmul_dtype=jnp.float32):
    x = jnp.concatenate([decoder_hidden, decoder_hiddens_mean_pooled], axis=1)
    h0, c0 = hidden
    H = h0.shape[-1]
    gates = (
        jnp.dot(x.astype(matmul_dtype), w_ih.T.astype(matmul_dtype),
                preferred_element_type=jnp.float32)
        + jnp.dot(h0[0].astype(matmul_dtype), w_hh.T.astype(matmul_dtype),
                  preferred_element_type=jnp.float32)
        + (b_ih + b_hh).astype(jnp.float32)
    )
    i_g = jax.nn.sigmoid(gates[:, 0 * H:1 * H])
    f_g = jax.nn.sigmoid(gates[:, 1 * H:2 * H])
    g_g = jnp.tanh(gates[:, 2 * H:3 * H])
    o_g = jax.nn.sigmoid(gates[:, 3 * H:4 * H])
    c_new = f_g * c0[0].astype(jnp.float32) + i_g * g_g
    h_new = o_g * jnp.tanh(c_new)
    return h_new[None], (h_new[None], c_new[None])


if __name__ == "__main__":
    # Small shapes consistent with the module.
    decoder_size = 32
    hidden_size = 32
    num_layers = 1
    num_directions = 1

    key = jax.random.PRNGKey(0)
    ks = jax.random.split(key, 4)

    # PyTorch-style parameter init: uniform(-k, k), k = 1/sqrt(H).
    k_init = 1.0 / np.sqrt(hidden_size)
    w_ih = jax.random.uniform(ks[0], (4 * hidden_size, 2 * decoder_size),
                              jnp.float32, -k_init, k_init)
    w_hh = jax.random.uniform(ks[1], (4 * hidden_size, hidden_size),
                              jnp.float32, -k_init, k_init)
    b_ih = jax.random.uniform(ks[2], (4 * hidden_size,), jnp.float32, -k_init, k_init)
    b_hh = jax.random.uniform(ks[3], (4 * hidden_size,), jnp.float32, -k_init, k_init)

    W_packed, b_packed = pack_lstm_params(w_ih, w_hh, b_ih, b_hh)
    params = {"W": W_packed, "b": b_packed}

    def run_case(batch, seed):
        kk = jax.random.split(jax.random.PRNGKey(seed), 4)
        dh = jax.random.normal(kk[0], (batch, decoder_size), jnp.float32)
        mp = jax.random.normal(kk[1], (batch, decoder_size), jnp.float32)
        h0 = jax.random.normal(kk[2], (num_layers * num_directions, batch,
                                       hidden_size), jnp.float32)
        c0 = jax.random.normal(kk[3], (num_layers * num_directions, batch,
                                       hidden_size), jnp.float32)

        output, (h_out, c_out) = global_reconstructor_forward(
            dh, mp, (h0, c0), params, hidden_size=hidden_size)
        jax.block_until_ready((output, h_out, c_out))

        # Tight check vs. a reference mirroring the bf16 matmul / f32 accumulate.
        out_bf, (h_bf, c_bf) = ref_forward(dh, mp, (h0, c0), w_ih, w_hh, b_ih, b_hh,
                                           matmul_dtype=jnp.bfloat16)
        np.testing.assert_allclose(np.asarray(output), np.asarray(out_bf),
                                   rtol=1e-4, atol=1e-4)
        np.testing.assert_allclose(np.asarray(h_out), np.asarray(h_bf),
                                   rtol=1e-4, atol=1e-4)
        np.testing.assert_allclose(np.asarray(c_out), np.asarray(c_bf),
                                   rtol=1e-4, atol=1e-4)

        # Loose check vs. the full-f32 PyTorch-semantics reference.
        out_f32, (h_f32, c_f32) = ref_forward(dh, mp, (h0, c0), w_ih, w_hh,
                                              b_ih, b_hh,
                                              matmul_dtype=jnp.float32)
        np.testing.assert_allclose(np.asarray(output), np.asarray(out_f32),
                                   rtol=3e-2, atol=3e-2)
        np.testing.assert_allclose(np.asarray(c_out), np.asarray(c_f32),
                                   rtol=3e-2, atol=3e-2)

    run_case(batch=2, seed=1)     # single tile
    run_case(batch=200, seed=2)   # multi-tile + padded remainder rows (bug-fix path)

    print("KERNEL_OK")
</pallas_src>

<mosaic_0001>
module attributes {stable_mosaic.version = 11 : i64} {
  func.func @lstm_step_kernel(%arg0: i32, %arg1: memref<8x128xbf16, #tpu.memory_space<vmem>>, %arg2: memref<8x32xf32, #tpu.memory_space<vmem>>, %arg3: memref<128x128xbf16, #tpu.memory_space<vmem>>, %arg4: memref<1x128xf32, #tpu.memory_space<vmem>>, %arg5: memref<8x32xf32, #tpu.memory_space<vmem>>, %arg6: memref<8x32xf32, #tpu.memory_space<vmem>>) attributes {dimension_semantics = [#tpu.dimension_semantics<parallel>], iteration_bounds = array<i64: 1>, scalar_prefetch = 0 : i64, scratch_operands = 0 : i64, tpu.core_type = #tpu.core_type<tc>, window_params = [{transform_indices = @transform_0, window_bounds = array<i64: 8, 128>}, {transform_indices = @transform_1, window_bounds = array<i64: 8, 32>}, {pipeline_mode = #tpu.pipeline_mode<synchronous>, transform_indices = @transform_2, window_bounds = array<i64: 128, 128>}, {pipeline_mode = #tpu.pipeline_mode<synchronous>, transform_indices = @transform_3, window_bounds = array<i64: 1, 128>}, {transform_indices = @transform_4, window_bounds = array<i64: 8, 32>}, {transform_indices = @transform_5, window_bounds = array<i64: 8, 32>}]} {
    %c0 = arith.constant 0 : index
    %c0_0 = arith.constant 0 : index
    %0 = vector.load %arg1[%c0, %c0_0] : memref<8x128xbf16, #tpu.memory_space<vmem>>, vector<8x128xbf16>
    %c0_1 = arith.constant 0 : index
    %c0_2 = arith.constant 0 : index
    %1 = vector.load %arg3[%c0_1, %c0_2] : memref<128x128xbf16, #tpu.memory_space<vmem>>, vector<128x128xbf16>
    %cst = arith.constant dense<0.000000e+00> : vector<8x128xf32>
    %2 = tpu.matmul %0, %1, %cst {dimension_numbers = #tpu.dot_dimension_numbers<[1], [0], [0], [1], [0, 0, 1, 1], [], []>} : vector<8x128xbf16>, vector<128x128xbf16>, vector<8x128xf32> -> vector<8x128xf32>
    %c0_3 = arith.constant 0 : index
    %c0_4 = arith.constant 0 : index
    %3 = vector.load %arg4[%c0_3, %c0_4] : memref<1x128xf32, #tpu.memory_space<vmem>>, vector<1x128xf32>
    %4 = vector.broadcast %3 : vector<1x128xf32> to vector<8x128xf32>
    %5 = arith.addf %2, %4 : vector<8x128xf32>
    %6 = tpu.iota {dimensions = array<i32: 1>} : vector<8x128xi32>
    %c64_i32 = arith.constant 64 : i32
    %7 = vector.broadcast %c64_i32 : i32 to vector<8x128xi32>
    %8 = arith.cmpi sge, %6, %7 : vector<8x128xi32>
    %c96_i32 = arith.constant 96 : i32
    %9 = vector.broadcast %c96_i32 : i32 to vector<8x128xi32>
    %10 = arith.cmpi slt, %6, %9 : vector<8x128xi32>
    %11 = arith.andi %8, %10 : vector<8x128xi1>
    %12 = math.tanh %5 : vector<8x128xf32>
    %13 = arith.negf %5 : vector<8x128xf32>
    %14 = math.exp %13 : vector<8x128xf32>
    %cst_5 = arith.constant 1.000000e+00 : f32
    %15 = vector.broadcast %cst_5 : f32 to vector<8x128xf32>
    %16 = arith.addf %15, %14 : vector<8x128xf32>
    %17 = arith.divf %15, %16 : vector<8x128xf32>
    %18 = arith.select %11, %12, %17 : vector<8x128xi1>, vector<8x128xf32>
    %19 = vector.extract_strided_slice %18 {offsets = [0, 0], sizes = [8, 32], strides = [1, 1]} : vector<8x128xf32> to vector<8x32xf32>
    %20 = vector.extract_strided_slice %18 {offsets = [0, 32], sizes = [8, 32], strides = [1, 1]} : vector<8x128xf32> to vector<8x32xf32>
    %21 = vector.extract_strided_slice %18 {offsets = [0, 64], sizes = [8, 32], strides = [1, 1]} : vector<8x128xf32> to vector<8x32xf32>
    %22 = vector.extract_strided_slice %18 {offsets = [0, 96], sizes = [8, 32], strides = [1, 1]} : vector<8x128xf32> to vector<8x32xf32>
    %c0_6 = arith.constant 0 : index
    %c0_7 = arith.constant 0 : index
    %23 = vector.load %arg2[%c0_6, %c0_7] : memref<8x32xf32, #tpu.memory_space<vmem>>, vector<8x32xf32>
    %24 = arith.mulf %20, %23 : vector<8x32xf32>
    %25 = arith.mulf %19, %21 : vector<8x32xf32>
    %26 = arith.addf %24, %25 : vector<8x32xf32>
    %27 = math.tanh %26 : vector<8x32xf32>
    %28 = arith.mulf %22, %27 : vector<8x32xf32>
    %c0_8 = arith.constant 0 : index
    %c0_9 = arith.constant 0 : index
    %29 = vector.load %arg6[%c0_8, %c0_9] : memref<8x32xf32, #tpu.memory_space<vmem>>, vector<8x32xf32>
    tpu.vector_store %arg6[%c0_8, %c0_9], %26 {strides = array<i32>} : memref<8x32xf32, #tpu.memory_space<vmem>>, vector<8x32xf32>,
    %c0_10 = arith.constant 0 : index
    %c0_11 = arith.constant 0 : index
    %30 = vector.load %arg5[%c0_10, %c0_11] : memref<8x32xf32, #tpu.memory_space<vmem>>, vector<8x32xf32>
    tpu.vector_store %arg5[%c0_10, %c0_11], %28 {strides = array<i32>} : memref<8x32xf32, #tpu.memory_space<vmem>>, vector<8x32xf32>,
    return
  }
  func.func @transform_0(%arg0: i32) -> (i32, i32) {
    %c0_i32 = arith.constant 0 : i32
    %c0_i32_0 = arith.constant 0 : i32
    return %arg0, %c0_i32 : i32, i32
  }
  func.func @transform_1(%arg0: i32) -> (i32, i32) {
    %c0_i32 = arith.constant 0 : i32
    %c0_i32_0 = arith.constant 0 : i32
    return %arg0, %c0_i32 : i32, i32
  }
  func.func @transform_2(%arg0: i32) -> (i32, i32) {
    %c0_i32 = arith.constant 0 : i32
    %c0_i32_0 = arith.constant 0 : i32
    %c0_i32_1 = arith.constant 0 : i32
    return %c0_i32, %c0_i32_0 : i32, i32
  }
  func.func @transform_3(%arg0: i32) -> (i32, i32) {
    %c0_i32 = arith.constant 0 : i32
    %c0_i32_0 = arith.constant 0 : i32
    %c0_i32_1 = arith.constant 0 : i32
    return %c0_i32, %c0_i32_0 : i32, i32
  }
  func.func @transform_4(%arg0: i32) -> (i32, i32) {
    %c0_i32 = arith.constant 0 : i32
    %c0_i32_0 = arith.constant 0 : i32
    return %arg0, %c0_i32 : i32, i32
  }
  func.func @transform_5(%arg0: i32) -> (i32, i32) {
    %c0_i32 = arith.constant 0 : i32
    %c0_i32_0 = arith.constant 0 : i32
    return %arg0, %c0_i32 : i32, i32
  }
}

</mosaic_0001>

<bundles_post_ra>
// kernel: global_reconstructor_forward.1
= control target key start
LH: loop header
LB: loop body
LE: loop exit
PB: predicated region body
PF: predicated region fallthrough
CT: control target
= control target key end

     0   :  { %11 = vsyncpa [#allocation3], 0  ;;  %s285_s18 = smov [#allocation2]   ;;  %s344_s0 = inlined_call_operand.vmem [shape: bf16[8,128], index: 0, kind: input, shape index: {}]   ;;  %s345_s1 = inlined_call_operand.vmem [shape: f32[8,32], index: 1, kind: input, shape index: {}]   ;;  %s346_s2 = inlined_call_operand.hbm [shape: bf16[128,128], index: 2, kind: input, shape index: {}]   ;;  %s347_s3 = inlined_call_operand.vmem [shape: f32[1,128], index: 3, kind: input, shape index: {}]   ;;  %s348_s4 = inlined_call_operand.vmem [shape: f32[8,32], index: 4, kind: output, shape index: {0}]   ;;  %s349_s5 = inlined_call_operand.vmem [shape: f32[8,32], index: 5, kind: output, shape index: {1}]  }
   0x1   :  { %s21_s19 = sshll.u32 %s285_s18, 4  ;;  %s22_s19 = int_to_ptr.vmem [resolvable:$true] %s21_s19 }
   0x2   :  { %s271_s20 = scalar_lea.vmem %s22_s19, 1024  ;;  %p276_p1 = scmp.lt.s32.totalorder %s22_s19, %s22_s19 }
   0x3   :  { %p272_p0 = scmp.ne.s32.totalorder %s22_s19, %s271_s20  ;;  %p277_p2 = scmp.lt.s32.totalorder %s271_s20, %s271_s20 }
   0x5   :  { %p278_p3 = por %p277_p2, %p276_p1 }
   0x7   :  { %p279_p4 = pnand %p278_p3, %p272_p0 }
   0x9   :  { %282 = shalt.err (!%p279_p4)
}
   0xa   :  { %s286_s21 = smov 64   ;;  %s287_s22 = smov 4  }
   0xb   :  { %27 = dma.hbm_to_vmem [thread:$0]  %s346_s2, 1024, %s22_s19, [#allocation3], %s286_s21, %s286_s21, %s287_s22  }
   0xc   :  { %283 = dma.done.wait [#allocation3], 1024  }
   0xd   :  { %284 = vsyncadd [#allocation3], 4294966272  ;;  %v288_v0 = vmov 0.0   ;;  %vm289_vm0 = vmmov 0   ;;  %v247_v1 = vld [vmem:[#allocation2 + $0x38] sm:$0xff]   ;;  %v248_v2 = vld [vmem:[#allocation2 + $0x30] sm:$0xff]   ;;  %v146_v19 = vlaneseq }
   0xe   :  { %220 = vmatprep.subr.bf16.mxu0 %v288_v0  ;;  %236 = vmatprep.mubr.msk.bf16.mxu0 %vm289_vm0, %v288_v0  ;;  %v249_v3 = vld [vmem:[#allocation2 + $0x28] sm:$0xff]   ;;  %v250_v4 = vld [vmem:[#allocation2 + $0x20] sm:$0xff]   ;;  %v251_v5 = vld [vmem:[#allocation2 + $0x18] sm:$0xff]   ;;  %s290_s28 = smov 32   ;;  %s291_s29 = smov 96   ;;  %vm185_vm4 = vcmask 261120  }
   0xf   :  { %221 = vmatpush3.bf16.msra.mxu0 %v247_v1  ;;  %v252_v6 = vld [vmem:[#allocation2 + $0x10] sm:$0xff]   ;;  %v253_v7 = vld [vmem:[#allocation2 + $0x8] sm:$0xff]   ;;  %v254_v8 = vld [vmem:[#allocation2] sm:$0xff]   ;;  %v147_v20 = vand.u32 127, %v146_v19 }
  0x10   :  { %222 = vmatprep.subr.bf16.mxu0 %v288_v0  ;;  %v34_v9 = vld [vmem:[%s344_s0] sm:$0xf] }
  0x11   :  { %v201_v10 = vld [vmem:[%s347_s3] ss:$0 sm:$0xff]  ;;  %vm148_vm1 = vcmp.ge.s32.totalorder %v147_v20, 64  ;;  %vm149_vm2 = vcmp.lt.s32.totalorder %v147_v20, 96 }
  0x12   :  { %vm150_vm3 = vmand %vm148_vm1, %vm149_vm2  ;;  %v159_v24 = vld [vmem:[%s345_s1] sm:$0xff] }
  0x13   :  { %223 = vmatpush3.bf16.msra.mxu0 %v248_v2 }
  0x14   :  { %224 = vmatprep.subr.bf16.mxu0 %v288_v0 }
  0x17   :  { %225 = vmatpush3.bf16.msra.mxu0 %v249_v3 }
  0x18   :  { %226 = vmatprep.subr.bf16.mxu0 %v288_v0 }
  0x1b   :  { %227 = vmatpush3.bf16.msra.mxu0 %v250_v4 }
  0x1c   :  { %228 = vmatprep.subr.bf16.mxu0 %v288_v0 }
  0x1f   :  { %229 = vmatpush3.bf16.msra.mxu0 %v251_v5 }
  0x20   :  { %230 = vmatprep.subr.bf16.mxu0 %v288_v0 }
  0x23   :  { %231 = vmatpush3.bf16.msra.mxu0 %v252_v6 }
  0x24   :  { %232 = vmatprep.subr.bf16.mxu0 %v288_v0 }
  0x27   :  { %233 = vmatpush3.bf16.msra.mxu0 %v253_v7 }
  0x28   :  { %234 = vmatprep.subr.bf16.mxu0 %v288_v0 }
  0x2b   :  { %235 = vmatpush3.bf16.msra.mxu0 %v254_v8 }
  0x2e   :  { %237 = vmatmul.mubr.bf16.vlgmr.msra.gmra.mxu0 %v34_v9 }
  0xee   :  { %v140_v11 = vpop.f32.mrf.mxu0 }
  0xef   :  { %v141_v12 = vadd.f32 %v201_v10, %v140_v11 }
  0xf0   :  { %v238_v13 = vpop.f32.mrf.mxu0 }
  0xf1   :  { %v210_v14 = vmul.f32 -1.442695, %v141_v12 }
  0xf2   :  { %v143_v15 = vpop.f32.mrf.mxu0 }
  0xf3   :  { %255 = vpow2.f32 %v210_v14 }
  0xf4   :  { %v239_v16 = vpop.f32.mrf.mxu0  ;;  %257 = vtanh.f32 %v141_v12 }
 0x100   :  { %v256_v17 = vpop.eup %255 }
 0x101   :  { %v155_v18 = vadd.f32 1.0, %v256_v17  ;;  %v258_v21 = vpop.eup %257 }
 0x103   :  { %259 = vrcp.f32 %v155_v18 }
 0x110   :  { %v260_v22 = vpop.eup %259 }
 0x111   :  { %v158_v23 = vsel %vm150_vm3, %v258_v21, %v260_v22 }
 0x112   :  { %166 = vrot.lane.b32.xlu0 %v158_v23, %s286_s21 }
 0x116   :  { %161 = vrot.lane.b32.xlu0 %v159_v24, %s290_s28 }
 0x184   :  { %v167_v25 = vpop.permute.xlu0 %166 }
 0x185   :  { %v169_v26 = vmul.f32 %v167_v25, %v158_v23 }
 0x187   :  { %171 = vrot.lane.b32.xlu1 %v169_v26, %s290_s28 }
 0x188   :  { %v162_v27 = vpop.permute.xlu0 %161 }
 0x189   :  { %v164_v28 = vmul.f32 %v162_v27, %v158_v23 }
 0x1f9   :  { %v172_v29 = vpop.permute.xlu1 %171 }
 0x1fa   :  { %v174_v30 = vadd.f32 %v172_v29, %v164_v28 }
 0x1fc   :  { %261 = vtanh.f32 %v174_v30  ;;  %182 = vrot.lane.b32.xlu0 %v174_v30, %s291_s29 }
 0x209   :  { %v262_v31 = vpop.eup %261 }
 0x20a   :  { %177 = vrot.lane.b32.xlu1 %v262_v31, %s286_s21 }
 0x26e   :  { %v183_v32 = vpop.permute.xlu0 %182 }
 0x26f   :  { %186 = vst.msk [vmem:[%s349_s5] sm:$0xff] %vm185_vm4, %v183_v32 }
 0x27c   :  { %v178_v33 = vpop.permute.xlu1 %177 }
 0x27d   :  { %v180_v34 = vmul.f32 %v178_v33, %v158_v23 }
 0x27f   :  { %188 = vrot.lane.b32.xlu1 %v180_v34, %s290_s28 }
 0x2f1   :  { %v189_v35 = vpop.permute.xlu1 %188 }
 0x2f2   :  { %191 = vst.msk [vmem:[%s348_s4] sm:$0xff] %vm185_vm4, %v189_v35 }
 0x2f3   :  { %200 = vsyncpa [#allocation3], 1 }

</bundles_post_ra>
